<compile_context>
chip_gen: v7x
topology: tpu7x:2x2x1
jax: 0.10.0
libtpu: 0.0.40
codegen_flags: <defaults>
</compile_context>

<pallas_src>
import jax
import jax.numpy as jnp
from jax.experimental import pallas as pl
from jax.experimental.pallas import tpu as pltpu


_LANE = 128


def _target_tile_bytes() -> int:
    """Per-score-tile byte target, chosen per TPU generation."""
    try:
        kind = jax.devices()[0].device_kind.lower()
    except Exception:
        kind = ""
    if "v7" in kind:
        # 3.2 TB/s HBM: 2 MiB tiles pay ~20-25% per-step overhead tax; 8 MiB
        # tiles cut it to ~5% while 4 double-buffered tiles stay < 40 MiB VMEM.
        return 8 * 1024 * 1024
    # v5e (~0.8 TB/s) / v6e (~1.4 TB/s): 2 MiB is already on the plateau.
    return 2 * 1024 * 1024


def _choose_tb(rows: int, lanes: int, itemsize: int, target_bytes: int,
               min_steps: int = 8) -> int:
    """Row-block giving ~target_bytes per score tile, sublane-aligned, while
    keeping the grid at least ~min_steps long when the problem allows it."""
    min_sub = max(8, 32 // itemsize)            # 8 (f32), 16 (bf16), 32 (i8)
    tb = max(min_sub, target_bytes // max(1, lanes * itemsize))
    # Keep >= min_steps grid steps so the DMA pipeline has depth and the v7x
    # megacore "parallel" sharding has work for both TensorCores.
    if rows >= min_steps * min_sub:
        tb = min(tb, rows // min_steps)
    tb = min(tb, rows)
    if tb < rows:
        tb = max(min_sub, (tb // min_sub) * min_sub)
    return tb


def _dice_kernel(c0_ref, c1_ref, score_ref, out_ref):
    cdt = c0_ref.dtype                           # compute dtype
    s = score_ref[...].astype(cdt)               # (tb, L)
    # One EUP push per element; the sigmoid's affine part is folded into the
    # per-lane (1, L) coefficient rows, so per element: 3 vmul + 1 vadd + tanh.
    t = jnp.tanh(0.5 * s)
    out_ref[...] = (s * (c0_ref[...] + c1_ref[...] * t)).astype(out_ref.dtype)


def dice(score: jax.Array, alpha: jax.Array, *,
         tb: int | None = None,
         compute_dtype=None,
         pack_lanes: bool = True,
         donate_score: bool = False) -> jax.Array:
    """score: (B, E); alpha: (E,). Returns alpha*(1-sigmoid(s))*s + sigmoid(s)*s."""
    B, E = score.shape
    assert alpha.shape == (E,)
    out_dtype = score.dtype
    itemsize = jnp.dtype(out_dtype).itemsize

    if compute_dtype is None:
        # f32 is safe on every generation (v5e has no bf16 VPU/EUP).
        # On v6e/v7x with bf16 activations, pass compute_dtype=jnp.bfloat16.
        compute_dtype = jnp.float32

    # Lane-dense repack: flatten (B, E<128) -> (B*E/128, 128) so every output
    # store is a full unmasked vst. Requires E | 128 and 128 | (B*E).
    # NOTE: this reshape may cost an XLA relayout copy around the kernel; keep
    # the packed shape across neighbouring ops or set pack_lanes=False if the
    # relayout shows up in xprof.
    if pack_lanes and E < _LANE and _LANE % E == 0 and (B * E) % _LANE == 0:
        reps = _LANE // E
        rows, lanes = (B * E) // _LANE, _LANE
        score2d = score.reshape(rows, lanes)
        alpha_row = jnp.tile(alpha, reps)
    else:
        rows, lanes = B, E
        score2d = score
        alpha_row = alpha

    a = alpha_row.astype(compute_dtype).reshape(1, lanes)
    c0 = 0.5 * (1.0 + a)                         # (1, lanes), resident in VMEM
    c1 = 0.5 * (1.0 - a)                         # (1, lanes), resident in VMEM

    if tb is None:
        tb = _choose_tb(rows, lanes, itemsize, _target_tile_bytes())
    tb = max(1, min(tb, rows))
    grid = (pl.cdiv(rows, tb),)

    # VMEM budget: double-buffered score-in + out tiles, tiny coefficient rows,
    # plus headroom. Clamp to a range safe on every generation (v7x: 64 MiB
    # physical VMEM, so keep the scoped limit <= ~40 MiB).
    tile_bytes = tb * lanes * itemsize
    vmem_budget = 2 * 2 * tile_bytes + 4 * lanes * jnp.dtype(compute_dtype).itemsize + (2 << 20)
    vmem_budget = int(min(max(vmem_budget, 16 << 20), 40 << 20))

    cost = pl.CostEstimate(
        flops=int(4 * rows * lanes),
        transcendentals=int(rows * lanes),
        bytes_accessed=int(2 * rows * lanes * itemsize),
    )

    out2d = pl.pallas_call(
        _dice_kernel,
        out_shape=jax.ShapeDtypeStruct((rows, lanes), out_dtype),
        grid_spec=pltpu.PrefetchScalarGridSpec(
            num_scalar_prefetch=0,
            grid=grid,
            in_specs=[
                pl.BlockSpec((1, lanes), lambda i: (0, 0)),    # c0: resident
                pl.BlockSpec((1, lanes), lambda i: (0, 0)),    # c1: resident
                pl.BlockSpec((tb, lanes), lambda i: (i, 0)),   # score tile
            ],
            out_specs=pl.BlockSpec((tb, lanes), lambda i: (i, 0)),
        ),
        compiler_params=pltpu.CompilerParams(
            dimension_semantics=("parallel",),
            vmem_limit_bytes=vmem_budget,
        ),
        cost_estimate=cost,
        input_output_aliases=({2: 0} if donate_score else {}),
    )(c0, c1, score2d)

    return out2d.reshape(B, E)


def _ref_dice(score, alpha):
    """Pure-JAX reference of the module's exact forward semantics."""
    p = jax.nn.sigmoid(score)
    return alpha[None, :] * (1.0 - p) * score + p * score


if __name__ == "__main__":
    key = jax.random.PRNGKey(0)
    k_s, k_a, k_s2, k_a2 = jax.random.split(key, 4)

    # Case 1: typical small shape, exercises the lane-dense packed path.
    B, E = 8, 32                                   # batch=8, emb_size=32
    score = jax.random.normal(k_s, (B, E), dtype=jnp.float32)
    # Module __init__ sets alpha = zeros((emb_size,)); use a deterministic
    # non-zero alpha so the per-lane broadcast path is actually exercised.
    alpha = jax.random.normal(k_a, (E,), dtype=jnp.float32) * 0.25

    out = jax.block_until_ready(dice(score, alpha))
    ref = _ref_dice(score, alpha)
    assert out.shape == (B, E) and out.dtype == jnp.float32
    assert jnp.allclose(out, ref, atol=1e-5, rtol=1e-5)

    # Case 2: shape that cannot be lane-packed (128 % 96 != 0) -> fallback
    # lanes=E path with masked stores; verifies the other branch compiles.
    B2, E2 = 7, 96
    score2 = jax.random.normal(k_s2, (B2, E2), dtype=jnp.float32)
    alpha2 = jax.random.normal(k_a2, (E2,), dtype=jnp.float32) * 0.25
    out2 = jax.block_until_ready(dice(score2, alpha2))
    ref2 = _ref_dice(score2, alpha2)
    assert out2.shape == (B2, E2)
    assert jnp.allclose(out2, ref2, atol=1e-5, rtol=1e-5)

    print("KERNEL_OK")
</pallas_src>

<mosaic_0001>
module attributes {stable_mosaic.version = 11 : i64} {
  func.func @_dice_kernel(%arg0: i32, %arg1: memref<1x128xf32, #tpu.memory_space<vmem>>, %arg2: memref<1x128xf32, #tpu.memory_space<vmem>>, %arg3: memref<2x128xf32, #tpu.memory_space<vmem>>, %arg4: memref<2x128xf32, #tpu.memory_space<vmem>>) attributes {dimension_semantics = [#tpu.dimension_semantics<parallel>], iteration_bounds = array<i64: 1>, scalar_prefetch = 0 : i64, scratch_operands = 0 : i64, tpu.core_type = #tpu.core_type<tc>, window_params = [{pipeline_mode = #tpu.pipeline_mode<synchronous>, transform_indices = @transform_0, window_bounds = array<i64: 1, 128>}, {pipeline_mode = #tpu.pipeline_mode<synchronous>, transform_indices = @transform_1, window_bounds = array<i64: 1, 128>}, {transform_indices = @transform_2, window_bounds = array<i64: 2, 128>}, {transform_indices = @transform_3, window_bounds = array<i64: 2, 128>}]} {
    %c0 = arith.constant 0 : index
    %c0_0 = arith.constant 0 : index
    %0 = vector.load %arg3[%c0, %c0_0] : memref<2x128xf32, #tpu.memory_space<vmem>>, vector<2x128xf32>
    %cst = arith.constant 5.000000e-01 : f32
    %1 = vector.broadcast %cst : f32 to vector<2x128xf32>
    %2 = arith.mulf %1, %0 : vector<2x128xf32>
    %3 = math.tanh %2 : vector<2x128xf32>
    %c0_1 = arith.constant 0 : index
    %c0_2 = arith.constant 0 : index
    %4 = vector.load %arg1[%c0_1, %c0_2] : memref<1x128xf32, #tpu.memory_space<vmem>>, vector<1x128xf32>
    %c0_3 = arith.constant 0 : index
    %c0_4 = arith.constant 0 : index
    %5 = vector.load %arg2[%c0_3, %c0_4] : memref<1x128xf32, #tpu.memory_space<vmem>>, vector<1x128xf32>
    %6 = vector.broadcast %5 : vector<1x128xf32> to vector<2x128xf32>
    %7 = arith.mulf %6, %3 : vector<2x128xf32>
    %8 = vector.broadcast %4 : vector<1x128xf32> to vector<2x128xf32>
    %9 = arith.addf %8, %7 : vector<2x128xf32>
    %10 = arith.mulf %0, %9 : vector<2x128xf32>
    %c0_5 = arith.constant 0 : index
    %c0_6 = arith.constant 0 : index
    %11 = vector.load %arg4[%c0_5, %c0_6] : memref<2x128xf32, #tpu.memory_space<vmem>>, vector<2x128xf32>
    tpu.vector_store %arg4[%c0_5, %c0_6], %10 {strides = array<i32>} : memref<2x128xf32, #tpu.memory_space<vmem>>, vector<2x128xf32>,
    return
  }
  func.func @transform_0(%arg0: i32) -> (i32, i32) {
    %c0_i32 = arith.constant 0 : i32
    %c0_i32_0 = arith.constant 0 : i32
    %c0_i32_1 = arith.constant 0 : i32
    return %c0_i32, %c0_i32_0 : i32, i32
  }
  func.func @transform_1(%arg0: i32) -> (i32, i32) {
    %c0_i32 = arith.constant 0 : i32
    %c0_i32_0 = arith.constant 0 : i32
    %c0_i32_1 = arith.constant 0 : i32
    return %c0_i32, %c0_i32_0 : i32, i32
  }
  func.func @transform_2(%arg0: i32) -> (i32, i32) {
    %c0_i32 = arith.constant 0 : i32
    %c0_i32_0 = arith.constant 0 : i32
    return %arg0, %c0_i32 : i32, i32
  }
  func.func @transform_3(%arg0: i32) -> (i32, i32) {
    %c0_i32 = arith.constant 0 : i32
    %c0_i32_0 = arith.constant 0 : i32
    return %arg0, %c0_i32 : i32, i32
  }
}

</mosaic_0001>

<bundles_post_ra>
// kernel: tpu_custom_call.1
= control target key start
LH: loop header
LB: loop body
LE: loop exit
PB: predicated region body
PF: predicated region fallthrough
CT: control target
= control target key end

     0   :  { %8 = vsyncpa [#allocation3], 0  ;;  %s169_s0 = inlined_call_operand.hbm [shape: f32[1,128], index: 0, kind: input, shape index: {}]   ;;  %s170_s1 = inlined_call_operand.vmem [shape: f32[1,128], index: 1, kind: input, shape index: {}]   ;;  %s171_s2 = inlined_call_operand.vmem [shape: f32[2,128], index: 2, kind: input, shape index: {}]   ;;  %s172_s3 = inlined_call_operand.hbm [shape: f32[2,128], index: 3, kind: output, shape index: {}]  }
   0x1   :  { %9 = vsyncpa [#allocation4], 0  ;;  %s117_s12 = smov [#allocation2]   ;;  %s69_s16 = scalar_lea.hbm %s169_s0, 16 }
   0x2   :  { %s16_s13 = sshll.u32 %s117_s12, 4  ;;  %p70_p0 = scmp.ne.s32.totalorder %s169_s0, %s69_s16  ;;  %s17_s13 = int_to_ptr.vmem [resolvable:$true] %s16_s13 }
   0x3   :  { %p73_p1 = scmp.lt.u32.totalorder %s69_s16, %s169_s0 }
   0x5   :  { %p75_p2 = pnand %p73_p1, %p70_p0 }
   0x7   :  { %78 = shalt.err (!%p75_p2)
}
   0x8   :  { %s79_s21 = scalar_lea.vmem %s17_s13, 16  ;;  %s83_s22 = scalar_lea.vmem %s17_s13, 32 }
   0x9   :  { %p80_p3 = scmp.ne.s32.totalorder %s17_s13, %s79_s21  ;;  %p84_p4 = scmp.lt.s32.totalorder %s17_s13, %s17_s13 }
   0xa   :  { %p85_p5 = scmp.lt.s32.totalorder %s83_s22, %s79_s21 }
   0xc   :  { %p86_p6 = por %p85_p5, %p84_p4 }
   0xe   :  { %p87_p7 = pnand %p86_p6, %p80_p3 }
  0x10   :  { %90 = shalt.err (!%p87_p7)
}
  0x11   :  { %19 = dma.hbm_to_vmem [thread:$0]  %s169_s0, 16, %s17_s13, [#allocation3]  }
  0x12   :  { %113 = dma.done.wait [#allocation3], 16  }
  0x13   :  { %114 = vsyncadd [#allocation3], 4294967280  ;;  %v27_v0 = vld [vmem:[%s171_s2] sm:$0x3]  ;;  %v64_v4 = vld [vmem:[#allocation2] ss:$0 sm:$0xff] }
  0x14   :  { %v28_v1 = vmul.f32 0.5, %v27_v0  ;;  %v63_v2 = vld [vmem:[%s170_s1] ss:$0 sm:$0xff]  ;;  %s118_s29 = smov [#allocation5]  }
  0x15   :  { %s54_s30 = sshll.u32 %s118_s29, 4  ;;  %s55_s30 = int_to_ptr.vmem [resolvable:$true] %s54_s30 }
  0x16   :  { %67 = vtanh.f32 %v28_v1  ;;  %s91_s0 = scalar_lea.vmem %s55_s30, 32  ;;  %p96_p9 = scmp.lt.s32.totalorder %s55_s30, %s55_s30 }
  0x17   :  { %p92_p8 = scmp.ne.s32.totalorder %s55_s30, %s91_s0  ;;  %p97_p10 = scmp.lt.s32.totalorder %s91_s0, %s91_s0 }
  0x19   :  { %p98_p11 = por %p97_p10, %p96_p9 }
  0x1b   :  { %p99_p12 = pnand %p98_p11, %p92_p8 }
  0x20   :  { %v68_v3 = vpop.eup %67 }
  0x21   :  { %v38_v5 = vmul.f32 %v68_v3, %v63_v2 }
  0x23   :  { %v45_v6 = vadd.f32 %v64_v4, %v38_v5 }
  0x25   :  { %v46_v7 = vmul.f32 %v45_v6, %v27_v0 }
  0x27   :  { %47 = vst [vmem:[#allocation5] sm:$0x3] %v46_v7 }
  0x28   :  { %102 = shalt.err (!%p99_p12)
}
  0x29   :  { %s103_s1 = scalar_lea.hbm %s172_s3, 32 }
  0x2a   :  { %p104_p13 = scmp.ne.s32.totalorder %s172_s3, %s103_s1  ;;  %p107_p0 = scmp.lt.u32.totalorder %s103_s1, %s172_s3 }
  0x2c   :  { %p109_p1 = pnand %p107_p0, %p104_p13 }
  0x2e   :  { %112 = shalt.err (!%p109_p1)
}
  0x2f   :  { %57 = dma.vmem_to_hbm [thread:$0]  %s55_s30, 32, %s172_s3, [#allocation4]  }
  0x30   :  { %115 = dma.done.wait [#allocation4], 32  }
  0x31   :  { %116 = vsyncadd [#allocation4], 4294967264 }
  0x32   :  { %61 = vsyncpa [#allocation3], 1 }
  0x33   :  { %62 = vsyncpa [#allocation4], 1 }

</bundles_post_ra>
